<compile_context>
chip_gen: v5e
topology: v5e:2x2
jax: 0.10.0
libtpu: 0.0.40
codegen_flags: <defaults>
</compile_context>

<pallas_src>
import jax
import jax.numpy as jnp
from jax.experimental import pallas as pl
from jax.experimental.pallas import tpu as pltpu


def _softmax_scale_kernel(x_ref, s_ref, o_ref):
    # x_ref: (TB, ns, TF)  — ns on sublanes, fused/padded ncls*d tile on lanes
    # s_ref: (1, TF)       — per-lane scale (weights[c] repeated over d)
    # o_ref: (TB, ns, TF)
    scale = s_ref[...].astype(jnp.float32)[None]      # (1, 1, TF)
    z = x_ref[...].astype(jnp.float32) * scale        # (TB, ns, TF)
    m = jnp.max(z, axis=1, keepdims=True)             # (TB, 1, TF)
    z = jnp.exp(z - m)                                # rebind: one live f32 temp
    denom = jnp.sum(z, axis=1, keepdims=True)         # (TB, 1, TF)
    o_ref[...] = (z / denom).astype(o_ref.dtype)      # exact normalization


def _pick_tiles(bs, ns, f_pad, itemsize, target_bytes=4 * 1024 * 1024,
                min_grid_steps=8):
    """Pick (TB, TF): block ~target_bytes, >=min_grid_steps blocks if possible.

    TF is a multiple of 128 dividing f_pad (never tiles the softmax `ns` axis);
    TB is a divisor of bs.  If the grid would be too small to feed both v7x
    TensorCores, shrink TB first, then TF.
    """
    tf_cands = [t for t in range(128, f_pad + 1, 128) if f_pad % t == 0]
    tb_cands = [t for t in range(1, bs + 1) if bs % t == 0]

    tf = 128
    for t in tf_cands:
        if ns * t * itemsize <= target_bytes:
            tf = t
    tb = 1
    for t in tb_cands:
        if t * ns * tf * itemsize <= target_bytes:
            tb = t

    def nsteps(tb_, tf_):
        return (bs // tb_) * (f_pad // tf_)

    while nsteps(tb, tf) < min_grid_steps:
        if tb > 1:
            tb = max(t for t in tb_cands if t < tb)
        elif tf > 128:
            tf = max(t for t in tf_cands if t < tf)
        else:
            break
    return tb, tf


def softmax_scale(x, weights):
    """x: (bs, ns, ncls, d); weights: (1, ncls) raw scale (as in the module)."""
    bs, ns, ncls, d = x.shape
    f = ncls * d
    f_pad = ((f + 127) // 128) * 128
    itemsize = jnp.dtype(x.dtype).itemsize

    # Fuse (ncls, d) into one dense lane axis; expand weight to per-lane scale.
    x2 = x.reshape(bs, ns, f)
    scale_flat = jnp.repeat(weights.reshape(ncls), d).reshape(1, f)
    if f_pad != f:
        # Zero-pad the lane axis: padded lanes compute an independent (finite)
        # softmax over zeros and are sliced away below.
        x2 = jnp.pad(x2, ((0, 0), (0, 0), (0, f_pad - f)))
        scale_flat = jnp.pad(scale_flat, ((0, 0), (0, f_pad - f)))

    tb, tf = _pick_tiles(bs, ns, f_pad, itemsize)
    # Lane-tile index OUTER, batch-tile index INNER so the scale block (0, j)
    # is unchanged across consecutive steps and its DMA is skipped.
    grid = (f_pad // tf, bs // tb)

    # VMEM footprint: double-buffered in + out blocks, ~2 live f32 full-tile
    # temporaries (compiler upper bound), double-buffered scale tile.
    blk_elems = tb * ns * tf
    footprint = (4 * blk_elems * itemsize
                 + 2 * blk_elems * 4
                 + 2 * tf * itemsize)
    vmem_limit = int(min(max(int(footprint * 1.5), 32 * 1024 * 1024),
                         48 * 1024 * 1024))

    n_elems = bs * ns * f_pad
    out = pl.pallas_call(
        _softmax_scale_kernel,
        out_shape=jax.ShapeDtypeStruct((bs, ns, f_pad), x.dtype),
        grid_spec=pltpu.PrefetchScalarGridSpec(
            num_scalar_prefetch=0,
            grid=grid,
            in_specs=[
                pl.BlockSpec((tb, ns, tf), lambda j, b: (b, 0, j)),
                pl.BlockSpec((1, tf), lambda j, b: (0, j)),
            ],
            out_specs=pl.BlockSpec((tb, ns, tf), lambda j, b: (b, 0, j)),
        ),
        compiler_params=pltpu.CompilerParams(
            dimension_semantics=("parallel", "parallel"),
            vmem_limit_bytes=vmem_limit,
        ),
        cost_estimate=pl.CostEstimate(
            flops=5 * n_elems,                           # mul, sub, max, add, div
            transcendentals=n_elems,                     # exp
            bytes_accessed=(2 * n_elems + f_pad) * itemsize,
        ),
    )(x2, scale_flat)

    return out[:, :, :f].reshape(bs, ns, ncls, d)


def softmax_scale_ref(x, weights):
    """Pure-JAX reference mirroring the PyTorch forward."""
    scale = weights[0][None, None, :, None]              # (1, 1, ncls, 1)
    return jax.nn.softmax(x * scale, axis=1)


if __name__ == "__main__":
    key = jax.random.PRNGKey(0)
    bs, ns, ncls, d = 2, 8, 4, 16

    x = jax.random.normal(key, (bs, ns, ncls, d), dtype=jnp.float32)
    # Deterministic parameter init, matching nn.Parameter(torch.ones(1, ncls) * 1.5)
    weights = jnp.ones((1, ncls), dtype=jnp.float32) * 1.5

    out = softmax_scale(x, weights)
    out = jax.block_until_ready(out)

    ref = softmax_scale_ref(x, weights)
    assert out.shape == (bs, ns, ncls, d)
    assert jnp.allclose(out, ref, atol=1e-5, rtol=1e-5), "mismatch vs reference"

    print("KERNEL_OK")
</pallas_src>

<mosaic_0001>
module attributes {stable_mosaic.version = 11 : i64} {
  func.func @_softmax_scale_kernel(%arg0: i32, %arg1: i32, %arg2: memref<1x8x128xf32, #tpu.memory_space<vmem>>, %arg3: memref<1x128xf32, #tpu.memory_space<vmem>>, %arg4: memref<1x8x128xf32, #tpu.memory_space<vmem>>) attributes {dimension_semantics = [#tpu.dimension_semantics<parallel>, #tpu.dimension_semantics<parallel>], iteration_bounds = array<i64: 1, 2>, scalar_prefetch = 0 : i64, scratch_operands = 0 : i64, tpu.core_type = #tpu.core_type<tc>, window_params = [{transform_indices = @transform_0, window_bounds = array<i64: 1, 8, 128>}, {transform_indices = @transform_1, window_bounds = array<i64: 1, 128>}, {transform_indices = @transform_2, window_bounds = array<i64: 1, 8, 128>}]} {
    %c0 = arith.constant 0 : index
    %c0_0 = arith.constant 0 : index
    %0 = vector.load %arg3[%c0, %c0_0] : memref<1x128xf32, #tpu.memory_space<vmem>>, vector<1x128xf32>
    %1 = vector.shape_cast %0 : vector<1x128xf32> to vector<1x1x128xf32>
    %c0_1 = arith.constant 0 : index
    %c0_2 = arith.constant 0 : index
    %c0_3 = arith.constant 0 : index
    %2 = vector.load %arg2[%c0_1, %c0_2, %c0_3] : memref<1x8x128xf32, #tpu.memory_space<vmem>>, vector<1x8x128xf32>
    %3 = vector.broadcast %1 : vector<1x1x128xf32> to vector<1x8x128xf32>
    %4 = arith.mulf %2, %3 : vector<1x8x128xf32>
    %cst = arith.constant dense<0xFF800000> : vector<1x128xf32>
    %5 = vector.multi_reduction <maximumf>, %4, %cst [1] : vector<1x8x128xf32> to vector<1x128xf32>
    %6 = vector.shape_cast %5 : vector<1x128xf32> to vector<1x1x128xf32>
    %7 = vector.broadcast %6 : vector<1x1x128xf32> to vector<1x8x128xf32>
    %8 = arith.subf %4, %7 : vector<1x8x128xf32>
    %9 = math.exp %8 : vector<1x8x128xf32>
    %cst_4 = arith.constant dense<0.000000e+00> : vector<1x128xf32>
    %10 = vector.multi_reduction <add>, %9, %cst_4 [1] : vector<1x8x128xf32> to vector<1x128xf32>
    %11 = vector.shape_cast %10 : vector<1x128xf32> to vector<1x1x128xf32>
    %12 = vector.broadcast %11 : vector<1x1x128xf32> to vector<1x8x128xf32>
    %13 = arith.divf %9, %12 : vector<1x8x128xf32>
    %c0_5 = arith.constant 0 : index
    %c0_6 = arith.constant 0 : index
    %c0_7 = arith.constant 0 : index
    %14 = vector.load %arg4[%c0_5, %c0_6, %c0_7] : memref<1x8x128xf32, #tpu.memory_space<vmem>>, vector<1x8x128xf32>
    tpu.vector_store %arg4[%c0_5, %c0_6, %c0_7], %13 {strides = array<i32>} : memref<1x8x128xf32, #tpu.memory_space<vmem>>, vector<1x8x128xf32>,
    return
  }
  func.func @transform_0(%arg0: i32, %arg1: i32) -> (i32, i32, i32) {
    %c0_i32 = arith.constant 0 : i32
    %c0_i32_0 = arith.constant 0 : i32
    return %arg1, %c0_i32, %arg0 : i32, i32, i32
  }
  func.func @transform_1(%arg0: i32, %arg1: i32) -> (i32, i32) {
    %c0_i32 = arith.constant 0 : i32
    %c0_i32_0 = arith.constant 0 : i32
    return %c0_i32, %arg0 : i32, i32
  }
  func.func @transform_2(%arg0: i32, %arg1: i32) -> (i32, i32, i32) {
    %c0_i32 = arith.constant 0 : i32
    %c0_i32_0 = arith.constant 0 : i32
    return %arg1, %c0_i32, %arg0 : i32, i32, i32
  }
}

</mosaic_0001>

<bundles_post_ra>
// kernel: tpu_custom_call.1
= control target key start
LH: loop header
LB: loop body
LE: loop exit
PB: predicated region body
PF: predicated region fallthrough
CT: control target
= control target key end

     0   :  { %7 = vsyncpa [#allocation3], 0  ;;  %s754_s0 = inlined_call_operand.hbm [shape: f32[2,8,128], index: 0, kind: input, shape index: {}]   ;;  %s755_s1 = inlined_call_operand.hbm [shape: f32[1,128], index: 1, kind: input, shape index: {}]   ;;  %s756_s2 = inlined_call_operand.hbm [shape: f32[2,8,128], index: 2, kind: output, shape index: {}]  }
   0x1   :  { %9 = vsyncpa [#allocation3 + $0x1], 0 }
   0x2   :  { %10 = vsyncpa [#allocation6], 0 }
   0x3   :  { %11 = vsyncpa [#allocation4], 0 }
   0x4   :  { %13 = vsyncpa [#allocation4 + $0x1], 0  ;;  %s601_s9 = smov 0   ;;  %s603_s10 = smov 0  }
   0x5   :  { %s605_s11 = smov 0   ;;  %s607_s12 = smov 0  }
   0x6   :  { %s609_s13 = smov 0   ;;  %s611_s14 = smov 0  }
   0x7 LB: > { %s344_s15 = sadd.s32 4294967295, %s583_s14   ;;  %s345_s16 = sadd.s32 4294967294, %s583_s14   ;;  %s583_s14 = sphi %s611_s14, %s19_s14   ;;  %s579_s13 = sphi %s609_s13, %s768_s13   ;;  %s575_s12 = sphi %s607_s12, %s767_s12   ;;  %s571_s11 = sphi %s605_s11, %s766_s11   ;;  %s567_s10 = sphi %s603_s10, %s765_s10   ;;  %s563_s9 = sphi %s601_s9, %s764_s9  }
   0x8   : > { %p53_p0 = scmp.ne.s32.totalorder %s567_s10, %s563_s9  ;;  %p635_p1 = scmp.eq.s32.totalorder %s344_s15, 0 }
   0x9   : > { %p639_p2 = scmp.eq.s32.totalorder %s344_s15, 1  ;;  %p111_p3 = scmp.eq.s32.totalorder %s345_s16, 1 }
   0xa   : > { %p645_p4 = por %p635_p1, %p53_p0  ;;  %p346_p5 = scmp.ge.s32.totalorder %s583_s14, 1 }
   0xb   : > { %p650_p6 = por %p111_p3, %p53_p0  ;;  %p118_p7 = scmp.lt.s32.totalorder %s583_s14, 3 }
   0xc   : > { %s131_s23 = sshll.u32 %s755_s1, 4  ;;  %p348_p9 = scmp.ge.s32.totalorder %s583_s14, 2  ;;  %s132_s23 = int_to_ptr.hbm [resolvable:$true] %s131_s23 }
   0xd   : > { %p658_p8 = pnand %p346_p5, %p118_p7  ;;  %s585_s25 = smov [#allocation5]  }
   0xe   : > { %s133_s26 = sshll.u32 %s585_s25, 4  ;;  %s28_s27 = sadd.s32 1, %s579_s13  ;;  %s134_s26 = int_to_ptr.vmem [resolvable:$true] %s133_s26 }
   0xf   : > { %p367_p10 = pneg %p658_p8  ;;  %p29_p12 = scmp.ge.s32.totalorder %s28_s27, 2 }
  0x10   : > { %s40_s28 = sadd.s32 1, %s571_s11  ;;  %p47_p13 = scmp.ne.s32.totalorder %s571_s11, %s567_s10 }
  0x11   : > { %p368_p11 = pnand %p367_p10, %p635_p1  ;;  %p48_p0 = scmp.eq.s32.totalorder %s583_s14, 0 }
  0x12   : > { %s770_s27 = smov (%p29_p12, %s28_s27), 0  ;;  %p680_p5 = por %p639_p2, %p47_p13 }
  0x13   : > { %370 = dma.hbm_to_vmem [thread:$0]  (!%p368_p11), %s132_s23, 16, %s134_s26, [#allocation6]  }
  0x14   : > { %p674_p3 = por %p48_p0, %p47_p13  ;;  %s35_s3 = ssub.s32 %s579_s13, %s770_s27 }
  0x15   : > { %p380_p7 = scmp.lt.s32.totalorder %s583_s14, 2  ;;  %p38_p10 = scmp.eq.s32.totalorder %s35_s3, 0 }
  0x16   : > { %s144_s4 = sand.u32 1, %s571_s11   ;;  %s350_s7 = sshll.u32 %s579_s13, 3 }
  0x17   : > { %s349_s5 = sshll.u32 %s144_s4, 3  ;;  %s153_s16 = scalar_lea.hbm %s754_s0, %s350_s7 }
  0x18   : > { %s689_s6 = scalar_select %p38_p10, %s571_s11, %s40_s28  }
  0x19   : > { %s148_s21 = scalar_lea.vmem [#allocation2], %s349_s5  ;;  %s155_s18 = sshll.u32 %s153_s16, 4  ;;  %s156_s18 = int_to_ptr.hbm [resolvable:$true] %s155_s18 }
  0x1a   : > { %s157_s22 = sshll.u32 %s148_s21, 4  ;;  %p372_p2 = pnand %p380_p7, %p674_p3  ;;  %s158_s22 = int_to_ptr.vmem [resolvable:$true] %s157_s22 }
  0x1b   : > { %s145_s23 = scalar_lea.sflag [#allocation3], %s144_s4  ;;  %166 = sbr.rel (%p658_p8) target bundleno = 95 (0x5f), region = 28 }
  0x1c   : > { %374 = dma.hbm_to_vmem [thread:$0]  (!%p372_p2), %s156_s18, 128, %s158_s22, %s145_s23  }
  0x1d   : > { %s700_s25 = sand.u32 (!%p658_p8), 1, %s567_s10  }
  0x1e   : > { %s352_s26 = sshll.u32 (!%p658_p8), %s700_s25, 3  ;;  %s169_s28 = scalar_lea.sflag (!%p658_p8), [#allocation3], %s700_s25 }
  0x1f   : > { %s172_s3 = scalar_lea.vmem (!%p658_p8), [#allocation2], %s352_s26 }
  0x20   : > { %550 = dma.done.wait (%p645_p4), %s169_s28, 128  }
  0x21   : > { %552 = vsyncadd (%p645_p4), %s169_s28, 4294967168 }
  0x22   : > { %554 = dma.done.wait (%p635_p1), [#allocation6], 16  }
  0x23   : > { %556 = vsyncadd (%p635_p1), [#allocation6], 4294967280  ;;  %v200_v0 = vld [vmem:[%s172_s3] sm:$0xff]  ;;  %v432_v1 = vld [vmem:[#allocation5] ss:$0 sm:$0xff]  ;;  %s356_s17 = sshll.u32 %s575_s12, 3 }
  0x24   : > { %v204_v2 = vmul.f32 %v432_v1, %v200_v0  ;;  %s248_s29 = scalar_lea.hbm %s756_s2, %s356_s17  ;;  %s198_s4 = scalar_lea.vmem [#allocation7], %s352_s26 }
  0x25   : > { %s250_s5 = sshll.u32 %s198_s4, 4  ;;  %s252_s7 = sshll.u32 %s248_s29, 4  ;;  %s251_s5 = int_to_ptr.vmem [resolvable:$true] %s250_s5  ;;  %s253_s7 = int_to_ptr.hbm [resolvable:$true] %s252_s7 }
  0x26   : > { %v205_v3 = vrot.slane %v204_v2, 4  ;;  %s237_s12 = scalar_lea.sflag [#allocation4], %s700_s25  ;;  %s511_s8 = sshra.s32 %s253_s7, 4  ;;  %s512_s8 = int_to_ptr.hbm [resolvable:$true] %s511_s8 }
  0x27   : > { %s513_s15 = scalar_lea.hbm %s512_s8, 8  ;;  %s517_s22 = scalar_lea.hbm %s756_s2, 16 }
  0x28   : > { %v206_v4 = vmax.f32 %v204_v2, %v205_v3  ;;  %p514_p1 = scmp.ne.s32.totalorder %s512_s8, %s513_s15  ;;  %p518_p11 = scmp.lt.s32.totalorder %s512_s8, %s756_s2 }
  0x29   : > { %p519_p12 = scmp.lt.s32.totalorder %s517_s22, %s513_s15 }
  0x2a   : > { %v207_v5 = vrot.slane %v206_v4, 2  ;;  %p515_p4 = pnand %p514_p1, %p680_p5 }
  0x2b   : > { %p520_p13 = por %p519_p12, %p518_p11 }
  0x2c   : > { %v208_v6 = vmax.f32 %v206_v4, %v207_v5  ;;  %p516_p8 = pneg %p515_p4 }
  0x2e   : > { %v209_v7 = vrot.slane %v208_v6, 1  ;;  %p521_p0 = pnand %p520_p13, %p516_p8 }
  0x30   : > { %v210_v8 = vmax.f32 %v208_v6, %v209_v7 }
  0x32   : > { %v211_v9 = vsub.f32 %v204_v2, %v210_v8 }
  0x34   : > { %v212_v10 = vmul.f32 1.442695, %v211_v9 }
  0x36   : > { %433 = vpow2.f32 %v212_v10 }
  0x3c   : > { %v434_v11 = vpop.eup %433 }
  0x3d   : > { %v214_v12 = vrot.slane %v434_v11, 4 }
  0x3f   : > { %v215_v13 = vadd.f32 %v434_v11, %v214_v12 }
  0x41   : > { %v216_v14 = vrot.slane %v215_v13, 2 }
  0x43   : > { %v217_v15 = vadd.f32 %v216_v14, %v215_v13 }
  0x45   : > { %v218_v16 = vrot.slane %v217_v15, 1 }
  0x47   : > { %v219_v17 = vadd.f32 %v218_v16, %v217_v15 }
  0x49   : > { %435 = vrcp.f32 %v219_v17  ;;  %v231_v20 = vand.u32 2147483648, %v219_v17  ;;  %vm225_vm0 = vweird.f32 %v219_v17  ;;  %v229_v22 = vand.u32 2147483647, %v219_v17 }
  0x4b   : > { %v232_v24 = vor.u32 1.1754944e-38, %v231_v20  ;;  %vm230_vm3 = vcmp.eq.f32.partialorder %v229_v22, 8.507059e+37 }
  0x4f   : > { %v436_v18 = vpop.eup %435 }
  0x50   : > { %v221_v19 = vmul.f32 %v436_v18, %v219_v17  ;;  %vm226_vm1 = vweird.f32 %v436_v18 }
  0x51   : > { %vm227_vm2 = vmor %vm225_vm0, %vm226_vm1 }
  0x52   : > { %v222_v21 = vsub.f32 1.0, %v221_v19 }
  0x54   : > { %v223_v23 = vmul.f32 %v436_v18, %v222_v21 }
  0x56   : > { %v224_v25 = vadd.f32 %v436_v18, %v223_v23 }
  0x58   : > { %v228_v26 = vsel %vm227_vm2, %v436_v18, %v224_v25 }
  0x59   : > { %v233_v27 = vsel %vm230_vm3, %v232_v24, %v228_v26 }
  0x5a   : > { %v234_v28 = vmul.f32 %v434_v11, %v233_v27 }
  0x5c   : > { %235 = vst [vmem:[%s198_s4] sm:$0xff] %v234_v28 }
  0x5d   : > { %524 = shalt.err (!%p521_p0)
}
  0x5e   : > { %365 = dma.vmem_to_hbm [thread:$0]  (%p680_p5), %s251_s5, 128, %s253_s7, %s237_s12  }
  0x5f PF: > { %s264_s25 = sand.u32 1, %s563_s9   ;;  %p376_p3 = pnand %p348_p9, %p650_p6 }
  0x60   : > { %s265_s26 = scalar_lea.sflag [#allocation4], %s264_s25 }
  0x61   : > { %p377_p7 = pneg %p376_p3 }
  0x63   : > { %558 = dma.done.wait (%p377_p7), %s265_s26, 128  }
  0x64   : > { %560 = vsyncadd (%p377_p7), %s265_s26, 4294967168  ;;  %s19_s14 = sadd.s32 1, %s583_s14   ;;  %s764_s9 = smov %s567_s10 }
  0x65   : > { %p16_p10 = scmp.ge.s32.totalorder %s19_s14, 4   ;;  %s765_s10 = smov %s571_s11 }
  0x66   : > { %s766_s11 = smov %s689_s6  ;;  %s767_s12 = smov %s579_s13 }
  0x67   : > { %s768_s13 = smov %s770_s27  ;;  %18 = sbr.rel (!%p16_p10) target bundleno = 7 (0x7), region = 78 }
  0x6c   :  { %271 = vsyncpa [#allocation3], 1 }
  0x6d   :  { %273 = vsyncpa [#allocation3 + $0x1], 1 }
  0x6e   :  { %274 = vsyncpa [#allocation6], 1 }
  0x6f   :  { %275 = vsyncpa [#allocation4], 1 }
  0x70   :  { %277 = vsyncpa [#allocation4 + $0x1], 1 }

</bundles_post_ra>
